<compile_context>
chip_gen: v6e
topology: v6e:2x2x1
jax: 0.10.0
libtpu: 0.0.40
codegen_flags: <defaults>
</compile_context>

<pallas_src>
import numpy as np

import jax
import jax.numpy as jnp
from jax.experimental import pallas as pl
from jax.experimental.pallas import tpu as pltpu


# ---------------------------------------------------------------------------
# Fused kernel: conv(as matmul) + LeakyReLU + Linear(F,64) + LeakyReLU + Linear(64,1)
# ---------------------------------------------------------------------------
def _fused_value_kernel(x_ref, wconv_ref, bconv_ref, w1_ref, b1_ref,
                        w2_ref, b2_ref, out_ref):
    # x_ref:     (TB, HW_pad)     bf16  flattened boards (one batch tile)
    # wconv_ref: (HW_pad, F_pad)  bf16  Conv2d expressed as a dense matrix
    # bconv_ref: (1, F_pad)       bf16  per-feature conv bias (zeros in padded tail)
    # w1_ref:    (F_pad, HID)     bf16  Linear(F, 64) weight^T, zero rows in padded tail
    # b1_ref:    (1, HID)         f32
    # w2_ref:    (1, HID)         f32   Linear(64, 1) weight as a row
    # b2_ref:    (1, 1)           f32   SMEM scalar
    # out_ref:   (TB, 1)          f32
    neg = 0.01  # PyTorch LeakyReLU default negative_slope

    # Conv2d(1->C, KxK, stride 1, valid) + flatten, as one lane-dense MXU
    # contraction over the flattened board (f32 accumulate), then bf16
    # bias + LeakyReLU (VPU runs packed bf16 at ~2x f32 rate on v6e/v7x).
    feat = jnp.dot(x_ref[...], wconv_ref[...],
                   preferred_element_type=jnp.float32)          # (TB, F_pad) f32
    feat = feat.astype(jnp.bfloat16) + bconv_ref[...]           # bf16
    feat = jnp.maximum(feat, neg * feat)                        # LeakyReLU (bf16)

    # Linear(F, 64) in bf16 on the MXU, f32 accumulate, + LeakyReLU (f32, small).
    h = jnp.dot(feat, w1_ref[...],
                preferred_element_type=jnp.float32)             # (TB, HID) f32
    h = h + b1_ref[...]
    h = jnp.maximum(h, neg * h)

    # Linear(64, 1) as a lane reduction (avoids a 1-lane-wide MXU result).
    out_ref[...] = (jnp.sum(h * w2_ref[...], axis=-1, keepdims=True)
                    + b2_ref[0, 0])


# ---------------------------------------------------------------------------
# Host-side parameter packing (call ONCE per parameter set, reuse the result)
# ---------------------------------------------------------------------------
def _round_up(x, m):
    return (x + m - 1) // m * m


def _cdiv(a, b):
    return -(-a // b)


def _conv_as_matrix(wc, H, W, HW_pad, F_pad):
    """Express Conv2d(1->C, KxK, stride=1, valid) as a dense (HW_pad, F_pad)
    matrix acting on row-major flattened boards. Output columns are in NCHW
    flatten order (c*Ho*Wo + oi*Wo + oj), so the downstream Linear weight needs
    no permutation. Padded rows/columns are zero. Indices are static numpy;
    only the values come from the conv weights."""
    C, K, _ = wc.shape
    Ho, Wo = H - K + 1, W - K + 1
    c, oi, oj, di, dj = np.indices((C, Ho, Wo, K, K))
    rows = ((oi + di) * W + (oj + dj)).reshape(-1)
    cols = (c * (Ho * Wo) + oi * Wo + oj).reshape(-1)
    vals = wc[c.reshape(-1), di.reshape(-1), dj.reshape(-1)]
    return jnp.zeros((HW_pad, F_pad), jnp.float32).at[rows, cols].set(vals)


def pack_params(params, board_size):
    """One-time packing of ValueNetwork params into lane-dense, MXU-ready
    arrays. Hoisted out of the per-call path (scatter + pads + casts are XLA
    ops that would otherwise run on every forward)."""
    H, W = board_size
    wc, bc, w1, b1, w2, b2 = (jnp.asarray(p, jnp.float32) for p in params)
    C, K, _ = wc.shape
    Ho, Wo = H - K + 1, W - K + 1
    F = C * Ho * Wo
    HID = w1.shape[-1]
    HW_pad = _round_up(H * W, 128)          # lane-dense contraction axis
    F_pad = _round_up(F, 128)               # e.g. 676 -> 768

    w_conv = _conv_as_matrix(wc, H, W, HW_pad, F_pad).astype(jnp.bfloat16)
    b_conv = jnp.concatenate(
        [jnp.repeat(bc, Ho * Wo),
         jnp.zeros((F_pad - F,), jnp.float32)])[None, :].astype(jnp.bfloat16)
    w1_pad = jnp.zeros((F_pad, HID), jnp.float32).at[:F].set(w1).astype(jnp.bfloat16)
    b1_row = b1.reshape(1, HID)
    w2_row = w2.reshape(1, HID)             # (64, 1) -> row vector
    b2_s = b2.reshape(1, 1)
    return (w_conv, b_conv, w1_pad, b1_row, w2_row, b2_s)


def _choose_batch_tile(B, batch_tile):
    """Pick a batch tile that (a) is a multiple of 8, (b) amortizes per-grid-step
    overhead, and (c) for non-tiny batches gives an even grid of >=2 steps so
    dimension_semantics=('parallel',) feeds both v7x TensorCores."""
    if B <= 256:
        return _round_up(B, 8)
    n = max(2, _cdiv(B, batch_tile))
    n += n % 2                               # even number of grid steps
    return _round_up(_cdiv(B, n), 8)


# ---------------------------------------------------------------------------
# Forward wrapper (per-call work = batch padding + one pallas_call)
# ---------------------------------------------------------------------------
def value_network_forward(boards, packed, *, batch_tile=2048):
    """Fused Pallas forward pass.

    boards: (B, H, W) or (H, W);  packed: result of pack_params()."""
    w_conv, b_conv, w1_pad, b1_row, w2_row, b2_s = packed
    boards = jnp.asarray(boards, jnp.float32)
    if boards.ndim == 2:
        boards = boards[None]
    B, H, W = boards.shape
    HW_pad, F_pad = w_conv.shape
    HID = w1_pad.shape[-1]

    TB = _choose_batch_tile(B, batch_tile)
    Bp = _round_up(B, TB)

    x = boards.reshape(B, H * W).astype(jnp.bfloat16)   # lane-dense, half the DMA
    if Bp != B or HW_pad != H * W:
        x = jnp.pad(x, ((0, Bp - B), (0, HW_pad - H * W)))

    smem = pltpu.MemorySpace.SMEM
    out = pl.pallas_call(
        _fused_value_kernel,
        out_shape=jax.ShapeDtypeStruct((Bp, 1), jnp.float32),
        grid=(Bp // TB,),
        in_specs=[
            pl.BlockSpec((TB, HW_pad), lambda b: (b, 0)),      # boards (per batch tile)
            pl.BlockSpec((HW_pad, F_pad), lambda b: (0, 0)),   # conv matrix (resident)
            pl.BlockSpec((1, F_pad), lambda b: (0, 0)),        # conv bias row (bf16)
            pl.BlockSpec((F_pad, HID), lambda b: (0, 0)),      # fc1 weight (resident)
            pl.BlockSpec((1, HID), lambda b: (0, 0)),          # fc1 bias
            pl.BlockSpec((1, HID), lambda b: (0, 0)),          # fc2 weight row
            pl.BlockSpec((1, 1), lambda b: (0, 0), memory_space=smem),  # fc2 bias
        ],
        out_specs=pl.BlockSpec((TB, 1), lambda b: (b, 0)),
        compiler_params=pltpu.CompilerParams(
            dimension_semantics=("parallel",),                 # megacore on v7x
            vmem_limit_bytes=64 << 20),                        # allow large batch tiles
    )(x, w_conv, b_conv, w1_pad, b1_row, w2_row, b2_s)

    return out[:B]


# ---------------------------------------------------------------------------
# Pure-JAX reference (same math, no Pallas) for correctness checking
# ---------------------------------------------------------------------------
def reference_forward(boards, params, *, match_kernel_bf16=True):
    wc, bc, w1, b1, w2, b2 = (jnp.asarray(p, jnp.float32) for p in params)
    boards = jnp.asarray(boards, jnp.float32)
    if boards.ndim == 2:
        boards = boards[None]
    B, H, W = boards.shape
    C, K, _ = wc.shape
    Ho, Wo = H - K + 1, W - K + 1

    if match_kernel_bf16:
        xb = boards.astype(jnp.bfloat16).astype(jnp.float32)
        wcb = wc.astype(jnp.bfloat16).astype(jnp.float32)
    else:
        xb, wcb = boards, wc

    # Conv (no bias yet), flattened in NCHW order to match the kernel's columns.
    conv = jnp.zeros((B, C, Ho, Wo), jnp.float32)
    for i in range(K):
        for j in range(K):
            conv = conv + xb[:, None, i:i + Ho, j:j + Wo] * wcb[None, :, i, j, None, None]
    feat = conv.reshape(B, -1)
    bias = jnp.repeat(bc, Ho * Wo)[None, :]

    if match_kernel_bf16:
        feat = feat.astype(jnp.bfloat16) + bias.astype(jnp.bfloat16)
        feat = jnp.maximum(feat, 0.01 * feat).astype(jnp.float32)
        w1m = w1.astype(jnp.bfloat16).astype(jnp.float32)
    else:
        feat = feat + bias
        feat = jnp.maximum(feat, 0.01 * feat)
        w1m = w1

    h = jnp.dot(feat, w1m, precision=jax.lax.Precision.HIGHEST) + b1.reshape(1, -1)
    h = jnp.maximum(h, 0.01 * h)
    return jnp.sum(h * w2.reshape(1, -1), axis=-1, keepdims=True) + b2.reshape(1, 1)


def init_params(key, board_size=(16, 16), n_channels=4, kernel_size=4):
    H, W = board_size
    C, K = n_channels, kernel_size
    Ho, Wo = H - K + 1, W - K + 1
    F = C * Ho * Wo
    k1, k2, k3, k4, k5, k6 = jax.random.split(key, 6)
    wc = jax.random.normal(k1, (C, K, K), jnp.float32) * 0.1   # Conv2d weight (C_in=1 squeezed)
    bc = jax.random.normal(k2, (C,), jnp.float32) * 0.1        # Conv2d bias
    w1 = jax.random.normal(k3, (F, 64), jnp.float32) * 0.05    # Linear(F, 64) weight^T
    b1 = jax.random.normal(k4, (1, 64), jnp.float32) * 0.05
    w2 = jax.random.normal(k5, (64, 1), jnp.float32) * 0.05    # Linear(64, 1) weight^T
    b2 = jax.random.normal(k6, (1, 1), jnp.float32) * 0.05
    return (wc, bc, w1, b1, w2, b2)


if __name__ == "__main__":
    key = jax.random.PRNGKey(0)
    kp, kx = jax.random.split(key)

    board_size = (16, 16)
    n_channels = 4
    kernel_size = 4
    batch = 2

    params = init_params(kp, board_size, n_channels, kernel_size)
    boards = jax.random.normal(kx, (batch,) + board_size, jnp.float32)

    # Pack parameters ONCE (hoisted out of the per-call path), then run the
    # fused kernel.
    packed = jax.tree_util.tree_map(jax.block_until_ready, pack_params(params, board_size))
    fwd = jax.jit(value_network_forward)
    value = jax.block_until_ready(fwd(boards, packed))

    # Strict check against a reference that mirrors the kernel's bf16 MXU/VPU
    # operands, plus a loose check against the pure-f32 math.
    ref_exact = reference_forward(boards, params, match_kernel_bf16=True)
    ref_f32 = reference_forward(boards, params, match_kernel_bf16=False)

    assert value.shape == (batch, 1), value.shape
    assert jnp.allclose(value, ref_exact, rtol=2e-4, atol=2e-4), (value, ref_exact)
    assert jnp.allclose(value, ref_f32, rtol=5e-2, atol=5e-2), (value, ref_f32)

    print("KERNEL_OK")
</pallas_src>

<mosaic_0001>
module attributes {stable_mosaic.version = 11 : i64} {
  func.func @_fused_value_kernel(%arg0: i32, %arg1: memref<8x256xbf16, #tpu.memory_space<vmem>>, %arg2: memref<256x768xbf16, #tpu.memory_space<vmem>>, %arg3: memref<1x768xbf16, #tpu.memory_space<vmem>>, %arg4: memref<768x64xbf16, #tpu.memory_space<vmem>>, %arg5: memref<1x64xf32, #tpu.memory_space<vmem>>, %arg6: memref<1x64xf32, #tpu.memory_space<vmem>>, %arg7: memref<1x1xf32, #tpu.memory_space<smem>>, %arg8: memref<8x1xf32, #tpu.memory_space<vmem>>) attributes {dimension_semantics = [#tpu.dimension_semantics<parallel>], iteration_bounds = array<i64: 1>, scalar_prefetch = 0 : i64, scratch_operands = 0 : i64, tpu.core_type = #tpu.core_type<tc>, window_params = [{transform_indices = @transform_0, window_bounds = array<i64: 8, 256>}, {pipeline_mode = #tpu.pipeline_mode<synchronous>, transform_indices = @transform_1, window_bounds = array<i64: 256, 768>}, {pipeline_mode = #tpu.pipeline_mode<synchronous>, transform_indices = @transform_2, window_bounds = array<i64: 1, 768>}, {pipeline_mode = #tpu.pipeline_mode<synchronous>, transform_indices = @transform_3, window_bounds = array<i64: 768, 64>}, {pipeline_mode = #tpu.pipeline_mode<synchronous>, transform_indices = @transform_4, window_bounds = array<i64: 1, 64>}, {pipeline_mode = #tpu.pipeline_mode<synchronous>, transform_indices = @transform_5, window_bounds = array<i64: 1, 64>}, {transform_indices = @transform_6, window_bounds = array<i64: 1, 1>}, {transform_indices = @transform_7, window_bounds = array<i64: 8, 1>}]} {
    %c0 = arith.constant 0 : index
    %c0_0 = arith.constant 0 : index
    %0 = vector.load %arg1[%c0, %c0_0] : memref<8x256xbf16, #tpu.memory_space<vmem>>, vector<8x256xbf16>
    %c0_1 = arith.constant 0 : index
    %c0_2 = arith.constant 0 : index
    %1 = vector.load %arg2[%c0_1, %c0_2] : memref<256x768xbf16, #tpu.memory_space<vmem>>, vector<256x768xbf16>
    %cst = arith.constant dense<0.000000e+00> : vector<8x768xf32>
    %2 = tpu.matmul %0, %1, %cst {dimension_numbers = #tpu.dot_dimension_numbers<[1], [0], [0], [1], [0, 0, 1, 1], [], []>} : vector<8x256xbf16>, vector<256x768xbf16>, vector<8x768xf32> -> vector<8x768xf32>
    %3 = arith.truncf %2 : vector<8x768xf32> to vector<8x768xbf16>
    %c0_3 = arith.constant 0 : index
    %c0_4 = arith.constant 0 : index
    %4 = vector.load %arg3[%c0_3, %c0_4] : memref<1x768xbf16, #tpu.memory_space<vmem>>, vector<1x768xbf16>
    %5 = vector.broadcast %4 : vector<1x768xbf16> to vector<8x768xbf16>
    %6 = arith.addf %3, %5 : vector<8x768xbf16>
    %cst_5 = arith.constant 1.000980e-02 : bf16
    %7 = vector.broadcast %cst_5 : bf16 to vector<8x768xbf16>
    %8 = arith.mulf %7, %6 : vector<8x768xbf16>
    %9 = arith.maximumf %6, %8 : vector<8x768xbf16>
    %c0_6 = arith.constant 0 : index
    %c0_7 = arith.constant 0 : index
    %10 = vector.load %arg4[%c0_6, %c0_7] : memref<768x64xbf16, #tpu.memory_space<vmem>>, vector<768x64xbf16>
    %cst_8 = arith.constant dense<0.000000e+00> : vector<8x64xf32>
    %11 = tpu.matmul %9, %10, %cst_8 {dimension_numbers = #tpu.dot_dimension_numbers<[1], [0], [0], [1], [0, 0, 1, 1], [], []>} : vector<8x768xbf16>, vector<768x64xbf16>, vector<8x64xf32> -> vector<8x64xf32>
    %c0_9 = arith.constant 0 : index
    %c0_10 = arith.constant 0 : index
    %12 = vector.load %arg5[%c0_9, %c0_10] : memref<1x64xf32, #tpu.memory_space<vmem>>, vector<1x64xf32>
    %13 = vector.broadcast %12 : vector<1x64xf32> to vector<8x64xf32>
    %14 = arith.addf %11, %13 : vector<8x64xf32>
    %cst_11 = arith.constant 0.00999999977 : f32
    %15 = vector.broadcast %cst_11 : f32 to vector<8x64xf32>
    %16 = arith.mulf %15, %14 : vector<8x64xf32>
    %17 = arith.maximumf %14, %16 : vector<8x64xf32>
    %c0_12 = arith.constant 0 : index
    %c0_13 = arith.constant 0 : index
    %18 = vector.load %arg6[%c0_12, %c0_13] : memref<1x64xf32, #tpu.memory_space<vmem>>, vector<1x64xf32>
    %19 = vector.broadcast %18 : vector<1x64xf32> to vector<8x64xf32>
    %20 = arith.mulf %17, %19 : vector<8x64xf32>
    %cst_14 = arith.constant dense<0.000000e+00> : vector<8xf32>
    %21 = vector.multi_reduction <add>, %20, %cst_14 [1] : vector<8x64xf32> to vector<8xf32>
    %22 = vector.shape_cast %21 : vector<8xf32> to vector<8x1xf32>
    %c0_15 = arith.constant 0 : index
    %c0_16 = arith.constant 0 : index
    %23 = memref.load %arg7[%c0_15, %c0_16] : memref<1x1xf32, #tpu.memory_space<smem>>
    %24 = vector.broadcast %23 : f32 to vector<8x1xf32>
    %25 = arith.addf %22, %24 : vector<8x1xf32>
    %c0_17 = arith.constant 0 : index
    %c0_18 = arith.constant 0 : index
    %26 = vector.load %arg8[%c0_17, %c0_18] : memref<8x1xf32, #tpu.memory_space<vmem>>, vector<8x1xf32>
    tpu.vector_store %arg8[%c0_17, %c0_18], %25 {strides = array<i32>} : memref<8x1xf32, #tpu.memory_space<vmem>>, vector<8x1xf32>,
    return
  }
  func.func @transform_0(%arg0: i32) -> (i32, i32) {
    %c0_i32 = arith.constant 0 : i32
    %c0_i32_0 = arith.constant 0 : i32
    return %arg0, %c0_i32 : i32, i32
  }
  func.func @transform_1(%arg0: i32) -> (i32, i32) {
    %c0_i32 = arith.constant 0 : i32
    %c0_i32_0 = arith.constant 0 : i32
    %c0_i32_1 = arith.constant 0 : i32
    return %c0_i32, %c0_i32_0 : i32, i32
  }
  func.func @transform_2(%arg0: i32) -> (i32, i32) {
    %c0_i32 = arith.constant 0 : i32
    %c0_i32_0 = arith.constant 0 : i32
    %c0_i32_1 = arith.constant 0 : i32
    return %c0_i32, %c0_i32_0 : i32, i32
  }
  func.func @transform_3(%arg0: i32) -> (i32, i32) {
    %c0_i32 = arith.constant 0 : i32
    %c0_i32_0 = arith.constant 0 : i32
    %c0_i32_1 = arith.constant 0 : i32
    return %c0_i32, %c0_i32_0 : i32, i32
  }
  func.func @transform_4(%arg0: i32) -> (i32, i32) {
    %c0_i32 = arith.constant 0 : i32
    %c0_i32_0 = arith.constant 0 : i32
    %c0_i32_1 = arith.constant 0 : i32
    return %c0_i32, %c0_i32_0 : i32, i32
  }
  func.func @transform_5(%arg0: i32) -> (i32, i32) {
    %c0_i32 = arith.constant 0 : i32
    %c0_i32_0 = arith.constant 0 : i32
    %c0_i32_1 = arith.constant 0 : i32
    return %c0_i32, %c0_i32_0 : i32, i32
  }
  func.func @transform_6(%arg0: i32) -> (i32, i32) {
    %c0_i32 = arith.constant 0 : i32
    %c0_i32_0 = arith.constant 0 : i32
    %c0_i32_1 = arith.constant 0 : i32
    return %c0_i32, %c0_i32_0 : i32, i32
  }
  func.func @transform_7(%arg0: i32) -> (i32, i32) {
    %c0_i32 = arith.constant 0 : i32
    %c0_i32_0 = arith.constant 0 : i32
    return %arg0, %c0_i32 : i32, i32
  }
}

</mosaic_0001>

<bundles_post_ra>
// kernel: value_network_forward.1
= control target key start
LH: loop header
LB: loop body
LE: loop exit
PB: predicated region body
PF: predicated region fallthrough
CT: control target
= control target key end

     0   :  { %13 = vsyncpa [#allocation4], 0  ;;  %s1835_s24 = smov [#allocation3]   ;;  %s2075_s0 = inlined_call_operand.vmem [shape: bf16[8,256], index: 0, kind: input, shape index: {}]   ;;  %s2076_s1 = inlined_call_operand.hbm [shape: bf16[256,768], index: 1, kind: input, shape index: {}]   ;;  %s2077_s2 = inlined_call_operand.vmem [shape: bf16[1,768], index: 2, kind: input, shape index: {}]   ;;  %s2078_s3 = inlined_call_operand.vmem [shape: bf16[768,64], index: 3, kind: input, shape index: {}]   ;;  %s2079_s4 = inlined_call_operand.vmem [shape: f32[1,64], index: 4, kind: input, shape index: {}]   ;;  %s2080_s5 = inlined_call_operand.vmem [shape: f32[1,64], index: 5, kind: input, shape index: {}]   ;;  %s2081_s6 = inlined_call_operand.<no memory space> [shape: f32[1,1], index: 6, kind: input, shape index: {}]   ;;  %s2082_s7 = inlined_call_operand.vmem [shape: f32[8,1], index: 7, kind: output, shape index: {}]  }
   0x1   :  { %s21_s25 = sshll.u32 %s1835_s24, 4  ;;  %s22_s25 = int_to_ptr.vmem [resolvable:$true] %s21_s25 }
   0x2   :  { %s1821_s26 = scalar_lea.vmem %s22_s25, 12288  ;;  %p1826_p1 = scmp.lt.s32.totalorder %s22_s25, %s22_s25 }
   0x3   :  { %p1822_p0 = scmp.ne.s32.totalorder %s22_s25, %s1821_s26  ;;  %p1827_p2 = scmp.lt.s32.totalorder %s1821_s26, %s1821_s26 }
   0x5   :  { %p1828_p3 = por %p1827_p2, %p1826_p1 }
   0x7   :  { %p1829_p4 = pnand %p1828_p3, %p1822_p0 }
   0x9   :  { %1832 = shalt.err (!%p1829_p4)
}
   0xa   :  { %s1836_s27 = smov 384   ;;  %s1837_s28 = smov 24  }
   0xb   :  { %27 = dma.hbm_to_vmem [thread:$0]  %s2076_s1, 12288, %s22_s25, [#allocation4], %s1836_s27, %s1836_s27, %s1837_s28  }
   0xc   :  { %1833 = dma.done.wait [#allocation4], 12288  }
   0xd   :  { %1834 = vsyncadd [#allocation4], 4294955008  ;;  %v1618_v0 = vld [vmem:[#allocation3 + $0x154] ss:$24 sps:$4 sm:$0xff]   ;;  %v1620_v1 = vld [vmem:[#allocation3 + $0x150] ss:$24 sps:$4 sm:$0xff]  }
   0xe   :  { %627 = vmatprep.subr.bf16.mxu0 %v1618_v0  ;;  %v1621_v2 = vld [vmem:[#allocation3 + $0x124] ss:$24 sps:$4 sm:$0xff]   ;;  %v1623_v3 = vld [vmem:[#allocation3 + $0x120] ss:$24 sps:$4 sm:$0xff]   ;;  %v1624_v4 = vld [vmem:[#allocation3 + $0xf4] ss:$24 sps:$4 sm:$0xff]  }
   0xf   :  { %628 = vmatpush1.bf16.msra.mxu0 %v1620_v1  ;;  %v1626_v5 = vld [vmem:[#allocation3 + $0xf0] ss:$24 sps:$4 sm:$0xff]   ;;  %v1627_v6 = vld [vmem:[#allocation3 + $0xc4] ss:$24 sps:$4 sm:$0xff]   ;;  %v1629_v7 = vld [vmem:[#allocation3 + $0xc0] ss:$24 sps:$4 sm:$0xff]  }
  0x10   :  { %629 = vmatprep.subr.bf16.mxu0 %v1621_v2  ;;  %v1642_v8 = vld [vmem:[#allocation3 + $0x15c] ss:$24 sps:$4 sm:$0xff]   ;;  %v1646_v10 = vld [vmem:[#allocation3 + $0x158] ss:$24 sps:$4 sm:$0xff]   ;;  %v1648_v11 = vld [vmem:[#allocation3 + $0x12c] ss:$24 sps:$4 sm:$0xff]  }
  0x11   :  { %v1630_v9 = vld [vmem:[#allocation3 + $0x94] ss:$24 sps:$4 sm:$0xff]   ;;  %668 = vmatprep.subr.bf16.mxu1 %v1642_v8  ;;  %v1632_v12 = vld [vmem:[#allocation3 + $0x90] ss:$24 sps:$4 sm:$0xff]   ;;  %v1633_v13 = vld [vmem:[#allocation3 + $0x64] ss:$24 sps:$4 sm:$0xff]  }
  0x12   :  { %669 = vmatpush1.bf16.msra.mxu1 %v1646_v10  ;;  %v1652_v14 = vld [vmem:[#allocation3 + $0x128] ss:$24 sps:$4 sm:$0xff]   ;;  %v1654_v15 = vld [vmem:[#allocation3 + $0xfc] ss:$24 sps:$4 sm:$0xff]   ;;  %v1658_v17 = vld [vmem:[#allocation3 + $0xf8] ss:$24 sps:$4 sm:$0xff]  }
  0x13   :  { %630 = vmatpush1.bf16.msra.mxu0 %v1623_v3  ;;  %670 = vmatprep.subr.bf16.mxu1 %v1648_v11  ;;  %v1635_v16 = vld [vmem:[#allocation3 + $0x60] ss:$24 sps:$4 sm:$0xff]   ;;  %v1660_v18 = vld [vmem:[#allocation3 + $0xcc] ss:$24 sps:$4 sm:$0xff]   ;;  %v1638_v21 = vld [vmem:[#allocation3 + $0x30] ss:$24 sps:$4 sm:$0xff]  }
  0x14   :  { %631 = vmatprep.subr.bf16.mxu0 %v1624_v4  ;;  %v1636_v19 = vld [vmem:[#allocation3 + $0x34] ss:$24 sps:$4 sm:$0xff]   ;;  %v1664_v20 = vld [vmem:[#allocation3 + $0xc8] ss:$24 sps:$4 sm:$0xff]   ;;  %v1639_v23 = vld [vmem:[#allocation3 + $0x4] ss:$24 sps:$4 sm:$0xff]  }
  0x15   :  { %v1666_v22 = vld [vmem:[#allocation3 + $0x9c] ss:$24 sps:$4 sm:$0xff]   ;;  %v1641_v24 = vld [vmem:[#allocation3] ss:$24 sps:$4 sm:$0xff]   ;;  %v1672_v26 = vld [vmem:[#allocation3 + $0x6c] ss:$24 sps:$4 sm:$0xff]  }
  0x16   :  { %671 = vmatpush1.bf16.msra.mxu1 %v1652_v14  ;;  %v1670_v25 = vld [vmem:[#allocation3 + $0x98] ss:$24 sps:$4 sm:$0xff]   ;;  %v1644_v27 = vld [vmem:[#allocation3 + $0x2d4] ss:$24 sps:$4 sm:$0xff]   ;;  %v1676_v28 = vld [vmem:[#allocation3 + $0x68] ss:$24 sps:$4 sm:$0xff]  }
  0x17   :  { %632 = vmatpush1.bf16.msra.mxu0 %v1626_v5  ;;  %672 = vmatprep.subr.bf16.mxu1 %v1654_v15  ;;  %v1647_v29 = vld [vmem:[#allocation3 + $0x2d0] ss:$24 sps:$4 sm:$0xff]   ;;  %v1650_v30 = vld [vmem:[#allocation3 + $0x2a4] ss:$24 sps:$4 sm:$0xff]   ;;  %v1653_v34 = vld [vmem:[#allocation3 + $0x2a0] ss:$24 sps:$4 sm:$0xff]  }
  0x18   :  { %633 = vmatprep.subr.bf16.mxu0 %v1627_v6  ;;  %v1678_v31 = vld [vmem:[#allocation3 + $0x3c] ss:$24 sps:$4 sm:$0xff]   ;;  %v43_v32 = vld [vmem:[%s2075_s0] sm:$0xff]  ;;  %v1682_v35 = vld [vmem:[#allocation3 + $0x38] ss:$24 sps:$4 sm:$0xff]   ;;  %vm1386_vm0 = vcmask 523264  }
  0x19   :  { %v1885_v33 = vcombine.high %v43_v32, %v43_v32  ;;  %v1684_v36 = vld [vmem:[#allocation3 + $0xc] ss:$24 sps:$4 sm:$0xff]   ;;  %v1659_v38 = vld [vmem:[#allocation3 + $0x270] ss:$24 sps:$4 sm:$0xff]   ;;  %v1691_v40 = vld [vmem:[#allocation3 + $0x2dc] ss:$24 sps:$4 sm:$0xff]   ;;  %v1889_v62 = vcombine.low %v43_v32, %v43_v32 }
  0x1a   :  { %673 = vmatpush1.bf16.msra.mxu1 %v1658_v17  ;;  %v1656_v37 = vld [vmem:[#allocation3 + $0x274] ss:$24 sps:$4 sm:$0xff]   ;;  %v1688_v39 = vld [vmem:[#allocation3 + $0x8] ss:$24 sps:$4 sm:$0xff]   ;;  %v1662_v41 = vld [vmem:[#allocation3 + $0x244] ss:$24 sps:$4 sm:$0xff]  }
  0x1b   :  { %634 = vmatpush1.bf16.msra.mxu0 %v1629_v7  ;;  %674 = vmatprep.subr.bf16.mxu1 %v1660_v18  ;;  %v1665_v42 = vld [vmem:[#allocation3 + $0x240] ss:$24 sps:$4 sm:$0xff]   ;;  %v1698_v44 = vld [vmem:[#allocation3 + $0x2ac] ss:$24 sps:$4 sm:$0xff]   ;;  %v1671_v46 = vld [vmem:[#allocation3 + $0x210] ss:$24 sps:$4 sm:$0xff]  }
  0x1c   :  { %635 = vmatprep.subr.bf16.mxu0 %v1630_v9  ;;  %659 = vmatprep.mubr.bf16.mxu0 %v1885_v33  ;;  %v1694_v43 = vld [vmem:[#allocation3 + $0x2d8] ss:$24 sps:$4 sm:$0xff]   ;;  %v1668_v45 = vld [vmem:[#allocation3 + $0x214] ss:$24 sps:$4 sm:$0xff]   ;;  %v1700_v47 = vld [vmem:[#allocation3 + $0x2a8] ss:$24 sps:$4 sm:$0xff]  }
  0x1d   :  { %700 = vmatprep.mubr.bf16.mxu1 %v1885_v33  ;;  %v1704_v48 = vld [vmem:[#allocation3 + $0x27c] ss:$24 sps:$4 sm:$0xff]   ;;  %v1677_v50 = vld [vmem:[#allocation3 + $0x1e0] ss:$24 sps:$4 sm:$0xff]   ;;  %v1710_v52 = vld [vmem:[#allocation3 + $0x24c] ss:$24 sps:$4 sm:$0xff]  }
  0x1e   :  { %675 = vmatpush1.bf16.msra.mxu1 %v1664_v20  ;;  %v1674_v49 = vld [vmem:[#allocation3 + $0x1e4] ss:$24 sps:$4 sm:$0xff]   ;;  %v1706_v51 = vld [vmem:[#allocation3 + $0x278] ss:$24 sps:$4 sm:$0xff]   ;;  %v1680_v53 = vld [vmem:[#allocation3 + $0x1b4] ss:$24 sps:$4 sm:$0xff]  }
  0x1f   :  { %636 = vmatpush1.bf16.msra.mxu0 %v1632_v12  ;;  %676 = vmatprep.subr.bf16.mxu1 %v1666_v22  ;;  %v1683_v54 = vld [vmem:[#allocation3 + $0x1b0] ss:$24 sps:$4 sm:$0xff]   ;;  %v1716_v56 = vld [vmem:[#allocation3 + $0x21c] ss:$24 sps:$4 sm:$0xff]   ;;  %v1689_v58 = vld [vmem:[#allocation3 + $0x180] ss:$24 sps:$4 sm:$0xff]  }
  0x20   :  { %637 = vmatprep.subr.bf16.mxu0 %v1633_v13  ;;  %v1712_v55 = vld [vmem:[#allocation3 + $0x248] ss:$24 sps:$4 sm:$0xff]   ;;  %v1686_v57 = vld [vmem:[#allocation3 + $0x184] ss:$24 sps:$4 sm:$0xff]   ;;  %v1718_v59 = vld [vmem:[#allocation3 + $0x218] ss:$24 sps:$4 sm:$0xff]  }
  0x21   :  { %v1722_v60 = vld [vmem:[#allocation3 + $0x1ec] ss:$24 sps:$4 sm:$0xff]   ;;  %v1695_v63 = vld [vmem:[#allocation3 + $0x160] ss:$24 sps:$4 sm:$0xff]   ;;  %v1728_v1 = vld [vmem:[#allocation3 + $0x1bc] ss:$24 sps:$4 sm:$0xff]  }
  0x22   :  { %677 = vmatpush1.bf16.msra.mxu1 %v1670_v25  ;;  %v1697_v61 = vld [vmem:[#allocation3 + $0x164] ss:$24 sps:$4 sm:$0xff]   ;;  %v1724_v0 = vld [vmem:[#allocation3 + $0x1e8] ss:$24 sps:$4 sm:$0xff]   ;;  %v1703_v2 = vld [vmem:[#allocation3 + $0x134] ss:$24 sps:$4 sm:$0xff]  }
  0x23   :  { %638 = vmatpush1.bf16.msra.mxu0 %v1635_v16  ;;  %678 = vmatprep.subr.bf16.mxu1 %v1672_v26  ;;  %v1701_v3 = vld [vmem:[#allocation3 + $0x130] ss:$24 sps:$4 sm:$0xff]   ;;  %v1734_v5 = vld [vmem:[#allocation3 + $0x18c] ss:$24 sps:$4 sm:$0xff]   ;;  %v1707_v7 = vld [vmem:[#allocation3 + $0x100] ss:$24 sps:$4 sm:$0xff]  }
  0x24   :  { %639 = vmatprep.subr.bf16.mxu0 %v1636_v19  ;;  %v1730_v4 = vld [vmem:[#allocation3 + $0x1b8] ss:$24 sps:$4 sm:$0xff]   ;;  %v1709_v6 = vld [vmem:[#allocation3 + $0x104] ss:$24 sps:$4 sm:$0xff]   ;;  %v1736_v8 = vld [vmem:[#allocation3 + $0x188] ss:$24 sps:$4 sm:$0xff]  }
  0x25   :  { %v1764_v9 = vld [vmem:[%s2078_s3 + $0x78] sm:$0xff]   ;;  %v1715_v10 = vld [vmem:[#allocation3 + $0xd4] ss:$24 sps:$4 sm:$0xff]   ;;  %v1713_v11 = vld [vmem:[#allocation3 + $0xd0] ss:$24 sps:$4 sm:$0xff]   ;;  %vm1393_vm1 = vcmask 7168  }
  0x26   :  { %679 = vmatpush1.bf16.msra.mxu1 %v1676_v28  ;;  %v1721_v12 = vld [vmem:[#allocation3 + $0xa4] ss:$24 sps:$4 sm:$0xff]   ;;  %v1766_v14 = vld [vmem:[%s2078_s3 + $0x70] sm:$0xff]   ;;  %v1719_v16 = vld [vmem:[#allocation3 + $0xa0] ss:$24 sps:$4 sm:$0xff]  }
  0x27   :  { %640 = vmatpush1.bf16.msra.mxu0 %v1638_v21  ;;  %680 = vmatprep.subr.bf16.mxu1 %v1678_v31  ;;  %v1765_v13 = vld [vmem:[%s2078_s3 + $0x38] sm:$0xff]   ;;  %v1767_v15 = vld [vmem:[%s2078_s3 + $0x30] sm:$0xff]   ;;  %v1768_v17 = vld [vmem:[%s2078_s3 + $0x68] sm:$0xff]  }
  0x28   :  { %641 = vmatprep.subr.bf16.mxu0 %v1639_v23  ;;  %v1727_v18 = vld [vmem:[#allocation3 + $0x74] ss:$24 sps:$4 sm:$0xff]   ;;  %v1725_v20 = vld [vmem:[#allocation3 + $0x70] ss:$24 sps:$4 sm:$0xff]   ;;  %v1770_v21 = vld [vmem:[%s2078_s3 + $0x60] sm:$0xff]  }
  0x29   :  { %v1769_v19 = vld [vmem:[%s2078_s3 + $0x28] sm:$0xff]   ;;  %v1733_v22 = vld [vmem:[#allocation3 + $0x44] ss:$24 sps:$4 sm:$0xff]   ;;  %v1740_v31 = vld [vmem:[#allocation3 + $0x2e0] ss:$24 sps:$4 sm:$0xff]  }
  0x2a   :  { %681 = vmatpush1.bf16.msra.mxu1 %v1682_v35  ;;  %v1771_v23 = vld [vmem:[%s2078_s3 + $0x20] sm:$0xff]   ;;  %v1772_v25 = vld [vmem:[%s2078_s3 + $0x58] sm:$0xff]   ;;  %v1739_v26 = vld [vmem:[#allocation3 + $0x14] ss:$24 sps:$4 sm:$0xff]  }
  0x2b   :  { %642 = vmatpush1.bf16.msra.mxu0 %v1641_v24  ;;  %682 = vmatprep.subr.bf16.mxu1 %v1684_v36  ;;  %v1731_v24 = vld [vmem:[#allocation3 + $0x40] ss:$24 sps:$4 sm:$0xff]   ;;  %v1737_v28 = vld [vmem:[#allocation3 + $0x10] ss:$24 sps:$4 sm:$0xff]   ;;  %v1745_v32 = vld [vmem:[#allocation3 + $0x2b4] ss:$24 sps:$4 sm:$0xff]  }
  0x2c   :  { %643 = vmatprep.subr.bf16.mxu0 %v1644_v27  ;;  %v1773_v27 = vld [vmem:[%s2078_s3 + $0x18] sm:$0xff]   ;;  %v1751_v36 = vld [vmem:[#allocation3 + $0x254] ss:$24 sps:$4 sm:$0xff]  }
  0x2d   :  { %v1746_v35 = vld [vmem:[#allocation3 + $0x280] ss:$24 sps:$4 sm:$0xff]  }
  0x2e   :  { %683 = vmatpush1.bf16.msra.mxu1 %v1688_v39  ;;  %v1752_v39 = vld [vmem:[#allocation3 + $0x220] ss:$24 sps:$4 sm:$0xff]  }
  0x2f   :  { %644 = vmatpush2.bf16.msra.mxu0 %v1647_v29  ;;  %684 = vmatprep.subr.bf16.mxu1 %v1691_v40  ;;  %v1774_v29 = vld [vmem:[%s2078_s3 + $0x50] sm:$0xff]  }
  0x30   :  { %645 = vmatprep.subr.bf16.mxu0 %v1650_v30  ;;  %v1742_v30 = vld [vmem:[#allocation3 + $0x2e4] ss:$24 sps:$4 sm:$0xff]   ;;  %v1757_v40 = vld [vmem:[#allocation3 + $0x1f4] ss:$24 sps:$4 sm:$0xff]  }
  0x32   :  { %685 = vmatpush2.bf16.msra.mxu1 %v1694_v43  ;;  %v1758_v43 = vld [vmem:[#allocation3 + $0x1c0] ss:$24 sps:$4 sm:$0xff]  }
  0x33   :  { %646 = vmatpush2.bf16.msra.mxu0 %v1653_v34  ;;  %686 = vmatprep.subr.bf16.mxu1 %v1698_v44  ;;  %v1748_v34 = vld [vmem:[#allocation3 + $0x284] ss:$24 sps:$4 sm:$0xff]   ;;  %v1763_v44 = vld [vmem:[#allocation3 + $0x194] ss:$24 sps:$4 sm:$0xff]  }
  0x34   :  { %647 = vmatprep.subr.bf16.mxu0 %v1656_v37  ;;  %v1749_v37 = vld [vmem:[#allocation3 + $0x250] ss:$24 sps:$4 sm:$0xff]  }
  0x36   :  { %687 = vmatpush2.bf16.msra.mxu1 %v1700_v47  ;;  %v1776_v47 = vld [vmem:[%s2078_s3 + $0x48] sm:$0xff]  }
  0x37   :  { %648 = vmatpush2.bf16.msra.mxu0 %v1659_v38  ;;  %688 = vmatprep.subr.bf16.mxu1 %v1704_v48  ;;  %v1754_v38 = vld [vmem:[#allocation3 + $0x224] ss:$24 sps:$4 sm:$0xff]   ;;  %v1777_v48 = vld [vmem:[%s2078_s3 + $0x8] sm:$0xff]  }
  0x38   :  { %649 = vmatprep.subr.bf16.mxu0 %v1662_v41  ;;  %v1755_v41 = vld [vmem:[#allocation3 + $0x1f0] ss:$24 sps:$4 sm:$0xff]  }
  0x3a   :  { %689 = vmatpush2.bf16.msra.mxu1 %v1706_v51  ;;  %v1780_v51 = vld [vmem:[%s2078_s3 + $0xf8] sm:$0xff]  }
  0x3b   :  { %650 = vmatpush2.bf16.msra.mxu0 %v1665_v42  ;;  %690 = vmatprep.subr.bf16.mxu1 %v1710_v52  ;;  %v1760_v42 = vld [vmem:[#allocation3 + $0x1c4] ss:$24 sps:$4 sm:$0xff]  }
  0x3c   :  { %651 = vmatprep.subr.bf16.mxu0 %v1668_v45  ;;  %v1761_v45 = vld [vmem:[#allocation3 + $0x190] ss:$24 sps:$4 sm:$0xff]   ;;  %v1796_v52 = vld [vmem:[%s2078_s3 + $0x178] sm:$0xff]  }
  0x3e   :  { %691 = vmatpush2.bf16.msra.mxu1 %v1712_v55  ;;  %v1799_v55 = vld [vmem:[%s2078_s3 + $0x130] sm:$0xff]  }
  0x3f   :  { %652 = vmatpush2.bf16.msra.mxu0 %v1671_v46  ;;  %692 = vmatprep.subr.bf16.mxu1 %v1716_v56  ;;  %v1775_v46 = vld [vmem:[%s2078_s3 + $0x10] sm:$0xff]   ;;  %v1800_v56 = vld [vmem:[%s2078_s3 + $0x168] sm:$0xff]  }
  0x40   :  { %653 = vmatprep.subr.bf16.mxu0 %v1674_v49  ;;  %v1778_v49 = vld [vmem:[%s2078_s3 + $0x40] sm:$0xff]  }
  0x42   :  { %693 = vmatpush2.bf16.msra.mxu1 %v1718_v59  ;;  %v1803_v59 = vld [vmem:[%s2078_s3 + $0x120] sm:$0xff]  }
  0x43   :  { %654 = vmatpush2.bf16.msra.mxu0 %v1677_v50  ;;  %694 = vmatprep.subr.bf16.mxu1 %v1722_v60  ;;  %v1779_v50 = vld [vmem:[%s2078_s3] sm:$0xff]   ;;  %v1804_v60 = vld [vmem:[%s2078_s3 + $0x158] sm:$0xff]  }
  0x44   :  { %655 = vmatprep.subr.bf16.mxu0 %v1680_v53  ;;  %v1797_v53 = vld [vmem:[%s2078_s3 + $0x138] sm:$0xff]  }
  0x46   :  { %695 = vmatpush2.bf16.msra.mxu1 %v1724_v0  ;;  %v1809_v0 = vld [vmem:[%s2078_s3 + $0x148] sm:$0xff]  }
  0x47   :  { %656 = vmatpush2.bf16.msra.mxu0 %v1683_v54  ;;  %696 = vmatprep.subr.bf16.mxu1 %v1728_v1  ;;  %v1798_v54 = vld [vmem:[%s2078_s3 + $0x170] sm:$0xff]   ;;  %v1810_v1 = vld [vmem:[%s2078_s3 + $0x108] sm:$0xff]  }
  0x48   :  { %657 = vmatprep.subr.bf16.mxu0 %v1686_v57  ;;  %v1801_v57 = vld [vmem:[%s2078_s3 + $0x128] sm:$0xff]  }
  0x4a   :  { %697 = vmatpush2.bf16.msra.mxu1 %v1730_v4  ;;  %v1838_v4 = vmov 1966171168  }
  0x4b   :  { %658 = vmatpush2.bf16.msra.mxu0 %v1689_v58  ;;  %698 = vmatprep.subr.bf16.mxu1 %v1734_v5  ;;  %v1802_v58 = vld [vmem:[%s2078_s3 + $0x160] sm:$0xff]   ;;  %v760_v5 = vunpack.c.l.s4 %v1838_v4 }
  0x4c   :  { %709 = vmatprep.subr.bf16.mxu0 %v1697_v61  ;;  %v1805_v61 = vld [vmem:[%s2078_s3 + $0x118] sm:$0xff]  }
  0x4e   :  { %660 = vmatmul.mubr.bf16.vlgmr.msra.gmra.mxu0 %v1889_v62  ;;  %699 = vmatpush2.bf16.msra.mxu1 %v1736_v8 }
  0x4f   :  { %710 = vmatpush1.bf16.msra.mxu0 %v1695_v63  ;;  %741 = vmatprep.mubr.bf16.mxu0 %v1885_v33  ;;  %v1743_v33 = vld [vmem:[#allocation3 + $0x2b0] ss:$24 sps:$4 sm:$0xff]  }
  0x50   :  { %711 = vmatprep.subr.bf16.mxu0 %v1703_v2  ;;  %1548 = vmatprep.subr.bf16.mxu1 %v1764_v9  ;;  %v1808_v63 = vld [vmem:[%s2078_s3 + $0x110] sm:$0xff]   ;;  %v1811_v2 = vld [vmem:[%s2078_s3 + $0x140] sm:$0xff]  }
  0x51   :  { %701 = vmatmul.mubr.bf16.vlgmr.msra.gmra.mxu1 %v1889_v62 }
  0x52   :  { %1549 = vmatpush3.bf16.msra.mxu1 %v1765_v13 }
  0x53   :  { %712 = vmatpush1.bf16.msra.mxu0 %v1701_v3  ;;  %1550 = vmatprep.subr.bf16.mxu1 %v1766_v14  ;;  %v1812_v3 = vld [vmem:[%s2078_s3 + $0x100] sm:$0xff]  }
  0x54   :  { %713 = vmatprep.subr.bf16.mxu0 %v1709_v6  ;;  %v762_v6 = vlaneseq }
  0x56   :  { %1551 = vmatpush3.bf16.msra.mxu1 %v1767_v15  ;;  %v763_v8 = vshrl.u32 %v762_v6, 7 }
  0x57   :  { %714 = vmatpush1.bf16.msra.mxu0 %v1707_v7  ;;  %1552 = vmatprep.subr.bf16.mxu1 %v1768_v17  ;;  %v761_v7 = vunpack.c.0.s8 %v760_v5 }
  0x58   :  { %715 = vmatprep.subr.bf16.mxu0 %v1715_v10  ;;  %v1999_v10 = vld [vmem:[%s2077_s2] sm:$0x3f] }
  0x59   :  { %v1994_v9 = vsub.s32 %v761_v7, %v763_v8 }
  0x5a   :  { %1553 = vmatpush3.bf16.msra.mxu1 %v1769_v19 }
  0x5b   :  { %716 = vmatpush1.bf16.msra.mxu0 %v1713_v11  ;;  %1554 = vmatprep.subr.bf16.mxu1 %v1770_v21  ;;  %v765_v11 = vrot.slane %v1999_v10, %v1994_v9 }
  0x5c   :  { %717 = vmatprep.subr.bf16.mxu0 %v1721_v12 }
  0x5d   :  { %v773_v12 = vcombine.high %v765_v11, %v765_v11  ;;  %v781_v13 = vrot.slane %v765_v11, %v1994_v9 }
  0x5e   :  { %1555 = vmatpush3.bf16.msra.mxu1 %v1771_v23 }
  0x5f   :  { %718 = vmatpush1.bf16.msra.mxu0 %v1719_v16  ;;  %1556 = vmatprep.subr.bf16.mxu1 %v1772_v25  ;;  %v795_v14 = vrot.slane %v773_v12, %v1994_v9  ;;  %v806_v15 = vpack.i.b16 %v781_v13, %v781_v13  ;;  %v2005_v16 = vsub.s32 0, %v763_v8 }
  0x60   :  { %719 = vmatprep.subr.bf16.mxu0 %v1727_v18 }
  0x61   :  { %v813_v17 = vpack.i.b16 %v795_v14, %v795_v14  ;;  %v811_v18 = vrot.slane %v806_v15, %v2005_v16 }
  0x62   :  { %1557 = vmatpush3.bf16.msra.mxu1 %v1773_v27 }
  0x63   :  { %720 = vmatpush1.bf16.msra.mxu0 %v1725_v20  ;;  %1558 = vmatprep.subr.bf16.mxu1 %v1774_v29  ;;  %v818_v21 = vrot.slane %v813_v17, %v2005_v16 }
  0x64   :  { %721 = vmatprep.subr.bf16.mxu0 %v1733_v22 }
  0x66   :  { %1559 = vmatpush3.bf16.msra.mxu1 %v1775_v46  ;;  %v1786_v46 = vld [vmem:[%s2078_s3 + $0xe0] sm:$0xff]  }
  0x67   :  { %722 = vmatpush1.bf16.msra.mxu0 %v1731_v24  ;;  %1560 = vmatprep.subr.bf16.mxu1 %v1776_v47 }
  0x68   :  { %723 = vmatprep.subr.bf16.mxu0 %v1739_v26  ;;  %v804_v26 = vcombine.high %v795_v14, %v795_v14 }
  0x6a   :  { %1561 = vmatpush3.bf16.msra.mxu1 %v1777_v48  ;;  %v803_v48 = vcombine.high %v781_v13, %v781_v13 }
  0x6b   :  { %724 = vmatpush1.bf16.msra.mxu0 %v1737_v28  ;;  %1562 = vmatprep.subr.bf16.mxu1 %v1778_v49 }
  0x6c   :  { %725 = vmatprep.subr.bf16.mxu0 %v1742_v30 }
  0x6e   :  { %1563 = vmatpush3.bf16.msra.mxu1 %v1779_v50  ;;  %v1787_v50 = vld [vmem:[%s2078_s3 + $0xa0] sm:$0xff]  }
  0x6f   :  { %726 = vmatpush2.bf16.msra.mxu0 %v1740_v31  ;;  %1570 = vmatprep.subr.bf16.mxu1 %v1780_v51  ;;  %v827_v31 = vpack.i.b16 %v804_v26, %v804_v26  ;;  %v1788_v51 = vld [vmem:[%s2078_s3 + $0xd8] sm:$0xff]  }
  0x70   :  { %727 = vmatprep.subr.bf16.mxu0 %v1745_v32 }
  0x73   :  { %728 = vmatpush2.bf16.msra.mxu0 %v1743_v33  ;;  %v1781_v33 = vld [vmem:[%s2078_s3 + $0xb8] sm:$0xff]  }
  0x74   :  { %729 = vmatprep.subr.bf16.mxu0 %v1748_v34 }
  0x77   :  { %730 = vmatpush2.bf16.msra.mxu0 %v1746_v35  ;;  %v1782_v35 = vld [vmem:[%s2078_s3 + $0xf0] sm:$0xff]  }
  0x78   :  { %731 = vmatprep.subr.bf16.mxu0 %v1751_v36 }
  0x7b   :  { %732 = vmatpush2.bf16.msra.mxu0 %v1749_v37  ;;  %v832_v37 = vrot.slane %v827_v31, %v2005_v16  ;;  %v1498_v31 = vld [vmem:[%s2079_s4] ss:$0 sm:$0xff] }
  0x7c   :  { %733 = vmatprep.subr.bf16.mxu0 %v1754_v38  ;;  %v1783_v38 = vld [vmem:[%s2078_s3 + $0xb0] sm:$0xff]  }
  0x7f   :  { %734 = vmatpush2.bf16.msra.mxu0 %v1752_v39 }
  0x80   :  { %735 = vmatprep.subr.bf16.mxu0 %v1757_v40  ;;  %v1784_v40 = vld [vmem:[%s2078_s3 + $0xe8] sm:$0xff]  }
  0x83   :  { %736 = vmatpush2.bf16.msra.mxu0 %v1755_v41 }
  0x84   :  { %737 = vmatprep.subr.bf16.mxu0 %v1760_v42 }
  0x87   :  { %738 = vmatpush2.bf16.msra.mxu0 %v1758_v43 }
  0x88   :  { %739 = vmatprep.subr.bf16.mxu0 %v1763_v44  ;;  %v1785_v44 = vld [vmem:[%s2078_s3 + $0xa8] sm:$0xff]  }
  0x8b   :  { %740 = vmatpush2.bf16.msra.mxu0 %v1761_v45 }
  0x8c   :  { %1592 = vmatprep.subr.bf16.mxu0 %v1796_v52  ;;  %v820_v52 = vpack.i.b16 %v803_v48, %v803_v48 }
  0x8e   :  { %742 = vmatmul.mubr.bf16.vlgmr.msra.gmra.mxu0 %v1889_v62  ;;  %v1807_v62 = vld [vmem:[%s2078_s3 + $0x150] sm:$0xff]  }
  0x8f   :  { %1593 = vmatpush3.bf16.msra.mxu0 %v1797_v53  ;;  %v1789_v53 = vld [vmem:[%s2078_s3 + $0x98] sm:$0xff]  }
  0x90   :  { %1594 = vmatprep.subr.bf16.mxu0 %v1798_v54  ;;  %v1790_v54 = vld [vmem:[%s2078_s3 + $0xd0] sm:$0xff]  }
  0x93   :  { %1595 = vmatpush3.bf16.msra.mxu0 %v1799_v55 }
  0x94   :  { %1596 = vmatprep.subr.bf16.mxu0 %v1800_v56  ;;  %v825_v56 = vrot.slane %v820_v52, %v2005_v16 }
  0x97   :  { %1597 = vmatpush3.bf16.msra.mxu0 %v1801_v57  ;;  %v1791_v57 = vld [vmem:[%s2078_s3 + $0x90] sm:$0xff]  }
  0x98   :  { %1598 = vmatprep.subr.bf16.mxu0 %v1802_v58  ;;  %v1792_v58 = vld [vmem:[%s2078_s3 + $0xc8] sm:$0xff]  }
  0x9b   :  { %1599 = vmatpush3.bf16.msra.mxu0 %v1803_v59 }
  0x9c   :  { %1600 = vmatprep.subr.bf16.mxu0 %v1804_v60  ;;  %v1793_v60 = vld [vmem:[%s2078_s3 + $0x88] sm:$0xff]  }
  0x9f   :  { %1601 = vmatpush3.bf16.msra.mxu0 %v1805_v61  ;;  %v1794_v61 = vld [vmem:[%s2078_s3 + $0xc0] sm:$0xff]  }
  0xa0   :  { %1602 = vmatprep.subr.bf16.mxu0 %v1807_v62 }
  0xa3   :  { %1603 = vmatpush3.bf16.msra.mxu0 %v1808_v63  ;;  %v1795_v63 = vld [vmem:[%s2078_s3 + $0x80] sm:$0xff]  }
  0xa4   :  { %1604 = vmatprep.subr.bf16.mxu0 %v1809_v0 }
  0xa7   :  { %1605 = vmatpush3.bf16.msra.mxu0 %v1810_v1  ;;  %v758_v1 = vcombine.high %v1999_v10, %v1999_v10 }
  0xa8   :  { %1606 = vmatprep.subr.bf16.mxu0 %v1811_v2 }
  0xa9   :  { %v772_v2 = vrot.slane %v758_v1, %v1994_v9 }
  0xab   :  { %1607 = vmatpush3.bf16.msra.mxu0 %v1812_v3  ;;  %v774_v3 = vcombine.high %v772_v2, %v772_v2  ;;  %v788_v4 = vrot.slane %v772_v2, %v1994_v9 }
  0xad   :  { %v802_v5 = vrot.slane %v774_v3, %v1994_v9  ;;  %v834_v6 = vpack.i.b16 %v788_v4, %v788_v4 }
  0xaf   :  { %v841_v7 = vpack.i.b16 %v802_v5, %v802_v5  ;;  %v839_v8 = vrot.slane %v834_v6, %v2005_v16 }
  0xb1   :  { %v846_v13 = vrot.slane %v841_v7, %v2005_v16 }
 0x10e   :  { %v661_v19 = vpop.f32.mrf.mxu0 }
 0x10f   :  { %v750_v20 = vpack.c.bf16 %v661_v19, %v661_v19 }
 0x110   :  { %v663_v22 = vpop.f32.mrf.mxu0 }
 0x111   :  { %v847_v23 = vadd.bf16 %v811_v18, %v750_v20  ;;  %v751_v24 = vpack.c.bf16 %v663_v22, %v663_v22  ;;  %v702_v36 = vpop.f32.mrf.mxu1 }
 0x112   :  { %v665_v25 = vpop.f32.mrf.mxu0  ;;  %v752_v55 = vpack.c.bf16 %v702_v36, %v702_v36 }
 0x113   :  { %v848_v27 = vadd.bf16 %v818_v21, %v751_v24  ;;  %v853_v28 = vmul.bf16 1009007652, %v847_v23  ;;  %v704_v39 = vpop.f32.mrf.mxu1 }
 0x114   :  { %v666_v29 = vpop.f32.mrf.mxu0  ;;  %v753_v41 = vpack.c.bf16 %v704_v39, %v704_v39  ;;  %v849_v59 = vadd.bf16 %v825_v56, %v752_v55 }
 0x115   :  { %v854_v30 = vmul.bf16 1009007652, %v848_v27  ;;  %v859_v34 = vmax.bf16 %v853_v28, %v847_v23  ;;  %v706_v42 = vpop.f32.mrf.mxu1 }
 0x116   :  { %v850_v43 = vadd.bf16 %v832_v37, %v753_v41  ;;  %v855_v62 = vmul.bf16 1009007652, %v849_v59  ;;  %v1547_v42 = vld [vmem:[%s2080_s5] ss:$0 sm:$0xff] }
 0x117   :  { %v860_v32 = vmax.bf16 %v854_v30, %v848_v27  ;;  %v707_v45 = vpop.f32.mrf.mxu1 }
 0x118   :  { %v856_v47 = vmul.bf16 1009007652, %v850_v43  ;;  %v861_v0 = vmax.bf16 %v855_v62, %v849_v59 }
 0x119   :  { %1288 = vmatprep.mubr.bf16.mxu1 %v860_v32 }
 0x11a   :  { %1289 = vmatmul.mubr.bf16.vlgmr.msra.gmra.mxu1 %v859_v34  ;;  %v862_v49 = vmax.bf16 %v856_v47, %v850_v43 }
 0x11b   :  { %1571 = vmatpush3.bf16.msra.mxu1 %v1781_v33 }
 0x11c   :  { %1572 = vmatprep.subr.bf16.mxu1 %v1782_v35  ;;  %1328 = vmatprep.mubr.bf16.mxu1 %v862_v49 }
 0x11f   :  { %1573 = vmatpush3.bf16.msra.mxu1 %v1783_v38 }
 0x120   :  { %1574 = vmatprep.subr.bf16.mxu1 %v1784_v40 }
 0x123   :  { %1575 = vmatpush3.bf16.msra.mxu1 %v1785_v44 }
 0x124   :  { %1576 = vmatprep.subr.bf16.mxu1 %v1786_v46  ;;  %v1391_v46 = vstv %s2081_s6 }
 0x127   :  { %1577 = vmatpush3.bf16.msra.mxu1 %v1787_v50 }
 0x128   :  { %1578 = vmatprep.subr.bf16.mxu1 %v1788_v51 }
 0x12b   :  { %1579 = vmatpush3.bf16.msra.mxu1 %v1789_v53 }
 0x12c   :  { %1580 = vmatprep.subr.bf16.mxu1 %v1790_v54 }
 0x12f   :  { %1581 = vmatpush3.bf16.msra.mxu1 %v1791_v57 }
 0x130   :  { %1582 = vmatprep.subr.bf16.mxu1 %v1792_v58 }
 0x133   :  { %1583 = vmatpush3.bf16.msra.mxu1 %v1793_v60 }
 0x134   :  { %1584 = vmatprep.subr.bf16.mxu1 %v1794_v61 }
 0x137   :  { %1585 = vmatpush3.bf16.msra.mxu1 %v1795_v63 }
 0x13a   :  { %1329 = vmatmul.mubr.bf16.vlgmr.msra.gmra.mxu1 %v861_v0 }
 0x14e   :  { %v743_v11 = vpop.f32.mrf.mxu0 }
 0x14f   :  { %v754_v12 = vpack.c.bf16 %v743_v11, %v743_v11 }
 0x150   :  { %v745_v14 = vpop.f32.mrf.mxu0 }
 0x151   :  { %v851_v15 = vadd.bf16 %v839_v8, %v754_v12  ;;  %v755_v17 = vpack.c.bf16 %v745_v14, %v745_v14 }
 0x152   :  { %v747_v18 = vpop.f32.mrf.mxu0 }
 0x153   :  { %v852_v10 = vadd.bf16 %v846_v13, %v755_v17  ;;  %v857_v19 = vmul.bf16 1009007652, %v851_v15 }
 0x154   :  { %v748_v20 = vpop.f32.mrf.mxu0 }
 0x155   :  { %v858_v21 = vmul.bf16 1009007652, %v852_v10  ;;  %v863_v23 = vmax.bf16 %v857_v19, %v851_v15 }
 0x157   :  { %v864_v22 = vmax.bf16 %v858_v21, %v852_v10 }
 0x159   :  { %1368 = vmatprep.mubr.bf16.mxu0 %v864_v22 }
 0x15a   :  { %1369 = vmatmul.mubr.bf16.vlgmr.msra.gmra.mxu0 %v863_v23 }
 0x1da   :  { %v1564_v9 = vpop.f32.mrf.mxu1 }
 0x1dc   :  { %v1565_v24 = vpop.f32.mrf.mxu1 }
 0x1dd   :  { %v1566_v30 = vadd.f32 %v1565_v24, %v1564_v9 }
 0x1de   :  { %v1567_v25 = vpop.f32.mrf.mxu1 }
 0x1df   :  { %v1291_v34 = vadd.f32 %v1566_v30, %v1498_v31 }
 0x1e0   :  { %v1568_v26 = vpop.f32.mrf.mxu1 }
 0x1fa   :  { %v1586_v27 = vpop.f32.mrf.mxu1 }
 0x1fc   :  { %v1587_v28 = vpop.f32.mrf.mxu1 }
 0x1fd   :  { %v1588_v32 = vadd.f32 %v1587_v28, %v1586_v27 }
 0x1fe   :  { %v1589_v29 = vpop.f32.mrf.mxu1 }
 0x1ff   :  { %v1331_v36 = vadd.f32 %v1588_v32, %v1291_v34 }
 0x200   :  { %v1590_v16 = vpop.f32.mrf.mxu1 }
 0x21a   :  { %v1608_v33 = vpop.f32.mrf.mxu0 }
 0x21c   :  { %v1609_v35 = vpop.f32.mrf.mxu0 }
 0x21d   :  { %v1610_v37 = vadd.f32 %v1609_v35, %v1608_v33 }
 0x21e   :  { %v1611_v38 = vpop.f32.mrf.mxu0 }
 0x21f   :  { %v1371_v39 = vadd.f32 %v1610_v37, %v1331_v36 }
 0x220   :  { %v1612_v40 = vpop.f32.mrf.mxu0 }
 0x221   :  { %v1376_v41 = vmul.f32 0.01, %v1371_v39 }
 0x223   :  { %v1377_v43 = vmax.f32 %v1371_v39, %v1376_v41 }
 0x225   :  { %v1385_v44 = vmul.f32 %v1547_v42, %v1377_v43 }
 0x227   :  { %v1387_v45 = vsel %vm1386_vm0, %v1385_v44, 0.0 }
 0x228   :  { %1388 = vadd.xlane.f32.xlu0 %v1387_v45 }
 0x2b1   :  { %v1389_v47 = vpop.xlane.xlu0 %1388 }
 0x2b2   :  { %v1392_v48 = vadd.f32 %v1391_v46, %v1389_v47 }
 0x2b4   :  { %1394 = vst.msk [vmem:[%s2082_s7] sm:$0xff] %vm1393_vm1, %v1392_v48 }
 0x2b5   :  { %1399 = vsyncpa [#allocation4], 1 }

</bundles_post_ra>
